<compile_context>
chip_gen: v7x
topology: tpu7x:2x2x1
jax: 0.10.0
libtpu: 0.0.40
codegen_flags: <defaults>
</compile_context>

<pallas_src>
import functools

import jax
import jax.numpy as jnp
from jax.experimental import pallas as pl
from jax.experimental.pallas import tpu as pltpu

# Keep the pure-JAX reference and the in-kernel matmuls at full f32 precision so
# the correctness check is apples-to-apples.
jax.config.update("jax_default_matmul_precision", "highest")


# ---------------------------------------------------------------------------
# Phase 1: recompose W from the LU parameterization + compute logdet (runs once)
# ---------------------------------------------------------------------------
def _weight_logdet_kernel(in_channel, w_p_ref, w_l_ref, w_u_ref, s_sign_ref,
                          w_s_ref, weight_ref, logdet_ref):
    """w_p/w_l/w_u: (S, S); s_sign/w_s: (1, S); weight: (S, S); logdet: (1, 1)."""
    S = w_p_ref.shape[0]
    row = jax.lax.broadcasted_iota(jnp.int32, (S, S), 0)
    col = jax.lax.broadcasted_iota(jnp.int32, (S, S), 1)
    l_mask = (row > col).astype(jnp.float32)   # strictly lower
    u_mask = (row < col).astype(jnp.float32)   # strictly upper
    eye = (row == col).astype(jnp.float32)

    w_s = w_s_ref[...]                          # (1, S)  = log|diag(U)|
    s_sign = s_sign_ref[...]                    # (1, S)
    diag_row = s_sign * jnp.exp(w_s)            # (1, S)  -> diagonal of U'

    lower = w_l_ref[...] * l_mask + eye                    # (S, S)
    upper = w_u_ref[...] * u_mask + eye * diag_row         # (S, S)

    lu = jnp.dot(lower, upper, preferred_element_type=jnp.float32)
    weight_ref[...] = jnp.dot(w_p_ref[...], lu,
                              preferred_element_type=jnp.float32)

    # logdet = in_channel * sum(w_s)
    logdet_ref[...] = float(in_channel) * jnp.sum(w_s, axis=1, keepdims=True)


# ---------------------------------------------------------------------------
# Phase 2: tiled application  out[b, :, tile] = W @ x[b, :, tile]
# ---------------------------------------------------------------------------
def _apply_kernel(w_ref, x_ref, o_ref):
    """w_ref: (S, S); x_ref/o_ref: (S, TC) -- batch dim squeezed away."""
    o_ref[...] = jnp.dot(w_ref[...], x_ref[...],
                         preferred_element_type=jnp.float32).astype(o_ref.dtype)


def _pick_channel_tile(C):
    # Lane-dense (multiple of 128) tile if possible; otherwise fall back to the
    # full channel extent (full-dim blocks are always legal).
    for t in (512, 256, 128):
        if C % t == 0:
            return t
    return C


def invconv1d_lu_forward(x, w_p, w_l, w_s, w_u, s_sign, *, channel_tile=None):
    """InvConv1dLU forward.  x: (B, S, C) f32.  Returns (out, logdet_scalar)."""
    B, S, C = x.shape

    # ---- phase 1: W (S, S) + logdet scalar, single tiny pallas_call ----
    weight, logdet = pl.pallas_call(
        functools.partial(_weight_logdet_kernel, C),
        out_shape=(
            jax.ShapeDtypeStruct((S, S), jnp.float32),
            jax.ShapeDtypeStruct((1, 1), jnp.float32),
        ),
    )(w_p, w_l, w_u, s_sign.reshape(1, S), w_s.reshape(1, S))

    # ---- phase 2: pipelined batched matmul over (batch, channel-tile) grid ----
    tc = channel_tile if channel_tile is not None else _pick_channel_tile(C)
    assert C % tc == 0, "channel tile must divide the channel dimension"
    grid = (B, C // tc)

    out = pl.pallas_call(
        _apply_kernel,
        out_shape=jax.ShapeDtypeStruct((B, S, C), x.dtype),
        grid=grid,
        in_specs=[
            # W stays resident in VMEM (same block index for every grid step).
            pl.BlockSpec((S, S), lambda b, j: (0, 0)),
            # x tile: one batch element, full seq, TC lane-dense channels.
            pl.BlockSpec((None, S, tc), lambda b, j: (b, 0, j)),
        ],
        out_specs=pl.BlockSpec((None, S, tc), lambda b, j: (b, 0, j)),
        compiler_params=pltpu.CompilerParams(
            dimension_semantics=("parallel", "parallel"),
        ),
    )(weight, x)

    return out, logdet[0, 0]


# ---------------------------------------------------------------------------
# Parameter construction (matches the PyTorch __init__) and plain-JAX reference
# ---------------------------------------------------------------------------
def init_invconv1d_lu_params(key, in_seq):
    w_init = jax.random.normal(key, (in_seq, in_seq), dtype=jnp.float32)
    q, _ = jnp.linalg.qr(w_init)
    w_p, w_l, w_u_full = jax.scipy.linalg.lu(q)
    w_s_diag = jnp.diag(w_u_full)
    return dict(
        w_p=w_p.astype(jnp.float32),
        w_l=w_l.astype(jnp.float32),
        w_u=jnp.triu(w_u_full, 1).astype(jnp.float32),
        s_sign=jnp.sign(w_s_diag).astype(jnp.float32),
        w_s=jnp.log(jnp.abs(w_s_diag)).astype(jnp.float32),
    )


def invconv1d_lu_reference(x, w_p, w_l, w_s, w_u, s_sign):
    S = w_p.shape[0]
    C = x.shape[2]
    u_mask = jnp.triu(jnp.ones((S, S), jnp.float32), 1)
    l_mask = u_mask.T
    weight = (
        w_p
        @ (w_l * l_mask + jnp.eye(S, dtype=jnp.float32))
        @ (w_u * u_mask + jnp.diag(s_sign * jnp.exp(w_s)))
    )
    out = jnp.einsum("st,btc->bsc", weight, x,
                     precision=jax.lax.Precision.HIGHEST)
    logdet = C * jnp.sum(w_s)
    return out, logdet


if __name__ == "__main__":
    batch, in_seq, in_channel = 2, 16, 256

    key = jax.random.PRNGKey(0)
    k_w, k_x = jax.random.split(key)
    params = init_invconv1d_lu_params(k_w, in_seq)
    x = jax.random.normal(k_x, (batch, in_seq, in_channel), dtype=jnp.float32)

    out, logdet = invconv1d_lu_forward(
        x, params["w_p"], params["w_l"], params["w_s"],
        params["w_u"], params["s_sign"])
    out = jax.block_until_ready(out)
    logdet = jax.block_until_ready(logdet)

    out_ref, logdet_ref = invconv1d_lu_reference(
        x, params["w_p"], params["w_l"], params["w_s"],
        params["w_u"], params["s_sign"])

    assert jnp.allclose(out, out_ref, atol=1e-3, rtol=1e-3), "output mismatch"
    assert jnp.allclose(logdet, logdet_ref, atol=1e-4, rtol=1e-4), "logdet mismatch"

    print("KERNEL_OK")
</pallas_src>

<mosaic_0001>
module attributes {stable_mosaic.version = 11 : i64} {
  func.func @_weight_logdet_kernel(%arg0: memref<16x16xf32, #tpu.memory_space<vmem>>, %arg1: memref<16x16xf32, #tpu.memory_space<vmem>>, %arg2: memref<16x16xf32, #tpu.memory_space<vmem>>, %arg3: memref<1x16xf32, #tpu.memory_space<vmem>>, %arg4: memref<1x16xf32, #tpu.memory_space<vmem>>, %arg5: memref<16x16xf32, #tpu.memory_space<vmem>>, %arg6: memref<1x1xf32, #tpu.memory_space<vmem>>) attributes {dimension_semantics = [], scalar_prefetch = 0 : i64, scratch_operands = 0 : i64, tpu.core_type = #tpu.core_type<tc>} {
    %0 = tpu.iota {dimensions = array<i32: 0>} : vector<16x16xi32>
    %1 = tpu.iota {dimensions = array<i32: 1>} : vector<16x16xi32>
    %2 = arith.cmpi sgt, %0, %1 : vector<16x16xi32>
    %3 = arith.extui %2 : vector<16x16xi1> to vector<16x16xi32>
    %4 = arith.sitofp %3 : vector<16x16xi32> to vector<16x16xf32>
    %5 = arith.cmpi slt, %0, %1 : vector<16x16xi32>
    %6 = arith.extui %5 : vector<16x16xi1> to vector<16x16xi32>
    %7 = arith.sitofp %6 : vector<16x16xi32> to vector<16x16xf32>
    %8 = arith.cmpi eq, %0, %1 : vector<16x16xi32>
    %9 = arith.extui %8 : vector<16x16xi1> to vector<16x16xi32>
    %10 = arith.sitofp %9 : vector<16x16xi32> to vector<16x16xf32>
    %c0 = arith.constant 0 : index
    %c0_0 = arith.constant 0 : index
    %11 = vector.load %arg4[%c0, %c0_0] : memref<1x16xf32, #tpu.memory_space<vmem>>, vector<1x16xf32>
    %c0_1 = arith.constant 0 : index
    %c0_2 = arith.constant 0 : index
    %12 = vector.load %arg3[%c0_1, %c0_2] : memref<1x16xf32, #tpu.memory_space<vmem>>, vector<1x16xf32>
    %13 = math.exp %11 : vector<1x16xf32>
    %14 = arith.mulf %12, %13 : vector<1x16xf32>
    %c0_3 = arith.constant 0 : index
    %c0_4 = arith.constant 0 : index
    %15 = vector.load %arg1[%c0_3, %c0_4] : memref<16x16xf32, #tpu.memory_space<vmem>>, vector<16x16xf32>
    %16 = arith.mulf %15, %4 : vector<16x16xf32>
    %17 = arith.addf %16, %10 : vector<16x16xf32>
    %c0_5 = arith.constant 0 : index
    %c0_6 = arith.constant 0 : index
    %18 = vector.load %arg2[%c0_5, %c0_6] : memref<16x16xf32, #tpu.memory_space<vmem>>, vector<16x16xf32>
    %19 = arith.mulf %18, %7 : vector<16x16xf32>
    %20 = vector.broadcast %14 : vector<1x16xf32> to vector<16x16xf32>
    %21 = arith.mulf %10, %20 : vector<16x16xf32>
    %22 = arith.addf %19, %21 : vector<16x16xf32>
    %cst = arith.constant dense<0.000000e+00> : vector<16x16xf32>
    %23 = tpu.matmul %17, %22, %cst {dimension_numbers = #tpu.dot_dimension_numbers<[1], [0], [0], [1], [0, 0, 1, 1], [], []>, precision = #tpu.contract_precision<fp32>} : vector<16x16xf32>, vector<16x16xf32>, vector<16x16xf32> -> vector<16x16xf32>
    %c0_7 = arith.constant 0 : index
    %c0_8 = arith.constant 0 : index
    %24 = vector.load %arg0[%c0_7, %c0_8] : memref<16x16xf32, #tpu.memory_space<vmem>>, vector<16x16xf32>
    %cst_9 = arith.constant dense<0.000000e+00> : vector<16x16xf32>
    %25 = tpu.matmul %24, %23, %cst_9 {dimension_numbers = #tpu.dot_dimension_numbers<[1], [0], [0], [1], [0, 0, 1, 1], [], []>, precision = #tpu.contract_precision<fp32>} : vector<16x16xf32>, vector<16x16xf32>, vector<16x16xf32> -> vector<16x16xf32>
    %c0_10 = arith.constant 0 : index
    %c0_11 = arith.constant 0 : index
    %26 = vector.load %arg5[%c0_10, %c0_11] : memref<16x16xf32, #tpu.memory_space<vmem>>, vector<16x16xf32>
    tpu.vector_store %arg5[%c0_10, %c0_11], %25 {strides = array<i32>} : memref<16x16xf32, #tpu.memory_space<vmem>>, vector<16x16xf32>,
    %cst_12 = arith.constant dense<0.000000e+00> : vector<1xf32>
    %27 = vector.multi_reduction <add>, %11, %cst_12 [1] : vector<1x16xf32> to vector<1xf32>
    %28 = vector.shape_cast %27 : vector<1xf32> to vector<1x1xf32>
    %cst_13 = arith.constant 2.560000e+02 : f32
    %29 = vector.broadcast %cst_13 : f32 to vector<1x1xf32>
    %30 = arith.mulf %29, %28 : vector<1x1xf32>
    %c0_14 = arith.constant 0 : index
    %c0_15 = arith.constant 0 : index
    %31 = vector.load %arg6[%c0_14, %c0_15] : memref<1x1xf32, #tpu.memory_space<vmem>>, vector<1x1xf32>
    tpu.vector_store %arg6[%c0_14, %c0_15], %30 {strides = array<i32>} : memref<1x1xf32, #tpu.memory_space<vmem>>, vector<1x1xf32>,
    return
  }
}

</mosaic_0001>

<bundles_post_ra>
// kernel: tpu_custom_call.1
= control target key start
LH: loop header
LB: loop body
LE: loop exit
PB: predicated region body
PF: predicated region fallthrough
CT: control target
= control target key end

     0   :  { %12 = vsyncpa [#allocation3], 0  ;;  %s1651_s0 = inlined_call_operand.hbm [shape: f32[16,16], index: 0, kind: input, shape index: {}]   ;;  %s1652_s1 = inlined_call_operand.hbm [shape: f32[16,16], index: 1, kind: input, shape index: {}]   ;;  %s1653_s2 = inlined_call_operand.hbm [shape: f32[16,16], index: 2, kind: input, shape index: {}]   ;;  %s1654_s3 = inlined_call_operand.vmem [shape: f32[1,16], index: 3, kind: input, shape index: {}]   ;;  %s1655_s4 = inlined_call_operand.vmem [shape: f32[1,16], index: 4, kind: input, shape index: {}]   ;;  %s1656_s5 = inlined_call_operand.hbm [shape: f32[16,16], index: 5, kind: output, shape index: {0}]   ;;  %s1657_s6 = inlined_call_operand.hbm [shape: f32[1,1], index: 6, kind: output, shape index: {1}]  }
   0x1   :  { %13 = vsyncpa [#allocation6], 0 }
   0x2   :  { %14 = vsyncpa [#allocation4], 0 }
   0x3   :  { %15 = vsyncpa [#allocation10], 0  ;;  %s1507_s21 = smov [#allocation5]   ;;  %s1508_s23 = smov [#allocation2]  }
   0x4   :  { %s33_s22 = sshll.u32 %s1507_s21, 4  ;;  %s21_s24 = sshll.u32 %s1508_s23, 4  ;;  %s34_s22 = int_to_ptr.vmem [resolvable:$true] %s33_s22  ;;  %s1550_s24 = int_to_ptr.vmem [resolvable:$true] %s21_s24 }
   0x5   :  { %s1389_s27 = scalar_lea.hbm %s1652_s1, 256 }
   0x6   :  { %p1390_p0 = scmp.ne.s32.totalorder %s1652_s1, %s1389_s27  ;;  %p1393_p1 = scmp.lt.u32.totalorder %s1389_s27, %s1652_s1 }
   0x8   :  { %p1395_p2 = pnand %p1393_p1, %p1390_p0 }
   0xa   :  { %1398 = shalt.err (!%p1395_p2)
}
   0xb   :  { %s1399_s8 = scalar_lea.vmem %s34_s22, 256  ;;  %p1404_p4 = scmp.lt.s32.totalorder %s34_s22, %s34_s22 }
   0xc   :  { %p1400_p3 = scmp.ne.s32.totalorder %s34_s22, %s1399_s8  ;;  %p1405_p5 = scmp.lt.s32.totalorder %s1399_s8, %s1399_s8 }
   0xe   :  { %p1406_p6 = por %p1405_p5, %p1404_p4 }
  0x10   :  { %p1407_p7 = pnand %p1406_p6, %p1400_p3 }
  0x12   :  { %1410 = shalt.err (!%p1407_p7)
}
  0x13   :  { %s1509_s9 = smov 128   ;;  %s1510_s10 = smov 8  }
  0x14   :  { %39 = dma.hbm_to_vmem [thread:$0]  %s1652_s1, 256, %s34_s22, [#allocation6], %s1509_s9, %s1509_s9, %s1510_s10  }
  0x15   :  { %s1411_s15 = scalar_lea.hbm %s1651_s0, 256 }
  0x16   :  { %p1412_p8 = scmp.ne.s32.totalorder %s1651_s0, %s1411_s15  ;;  %p1415_p9 = scmp.lt.u32.totalorder %s1411_s15, %s1651_s0 }
  0x18   :  { %p1417_p10 = pnand %p1415_p9, %p1412_p8 }
  0x1a   :  { %1420 = shalt.err (!%p1417_p10)
}
  0x1b   :  { %s1421_s20 = scalar_lea.vmem %s1550_s24, 256  ;;  %p1426_p12 = scmp.lt.s32.totalorder %s1550_s24, %s1550_s24 }
  0x1c   :  { %p1422_p11 = scmp.ne.s32.totalorder %s1550_s24, %s1421_s20  ;;  %p1427_p13 = scmp.lt.s32.totalorder %s1421_s20, %s1421_s20 }
  0x1e   :  { %p1428_p0 = por %p1427_p13, %p1426_p12 }
  0x20   :  { %p1429_p1 = pnand %p1428_p0, %p1422_p11 }
  0x22   :  { %1432 = shalt.err (!%p1429_p1)
}
  0x23   :  { %27 = dma.hbm_to_vmem [thread:$0]  %s1651_s0, 256, %s1550_s24, [#allocation3], %s1509_s9, %s1509_s9, %s1510_s10  }
  0x24   :  { %s1511_s22 = smov [#allocation7]   ;;  %s1433_s27 = scalar_lea.hbm %s1653_s2, 256 }
  0x25   :  { %s45_s23 = sshll.u32 %s1511_s22, 4  ;;  %p1434_p2 = scmp.ne.s32.totalorder %s1653_s2, %s1433_s27  ;;  %s46_s23 = int_to_ptr.vmem [resolvable:$true] %s45_s23 }
  0x26   :  { %p1437_p3 = scmp.lt.u32.totalorder %s1433_s27, %s1653_s2 }
  0x28   :  { %p1439_p4 = pnand %p1437_p3, %p1434_p2 }
  0x2a   :  { %1442 = shalt.err (!%p1439_p4)
}
  0x2b   :  { %s1443_s8 = scalar_lea.vmem %s46_s23, 256  ;;  %p1448_p6 = scmp.lt.s32.totalorder %s46_s23, %s46_s23 }
  0x2c   :  { %p1444_p5 = scmp.ne.s32.totalorder %s46_s23, %s1443_s8  ;;  %p1449_p7 = scmp.lt.s32.totalorder %s1443_s8, %s1443_s8 }
  0x2e   :  { %p1450_p8 = por %p1449_p7, %p1448_p6 }
  0x30   :  { %p1451_p9 = pnand %p1450_p8, %p1444_p5 }
  0x32   :  { %1454 = shalt.err (!%p1451_p9)
}
  0x33   :  { %51 = dma.hbm_to_vmem [thread:$0]  %s1653_s2, 256, %s46_s23, [#allocation6], %s1509_s9, %s1509_s9, %s1510_s10  }
  0x34   :  { %1499 = dma.done.wait [#allocation3], 256  }
  0x35   :  { %1500 = vsyncadd [#allocation3], 4294967040 }
  0x36   :  { %1501 = dma.done.wait [#allocation6], 512  }
  0x37   :  { %1502 = vsyncadd [#allocation6], 4294966784  ;;  %v65_v0 = vlaneseq  ;;  %v1512_v4 = vmov 0.0   ;;  %v1605_v6 = vld [vmem:[%s1655_s4] sm:$0x1]  ;;  %v93_v9 = vld [vmem:[#allocation5] sm:$0xff] }
  0x38   :  { %v90_v8 = vmul.f32 1.442695, %v1605_v6  ;;  %v94_v13 = vld [vmem:[#allocation5 + $0x8] sm:$0xff]  ;;  %vm113_vm4 = vcmask 130048   ;;  %v89_v22 = vld [vmem:[%s1654_s3] sm:$0x1] }
  0x39   :  { %v66_v1 = vshrl.u32 %v65_v0, 7  ;;  %v69_v2 = vand.u32 127, %v65_v0  ;;  %v99_v28 = vld [vmem:[#allocation7] sm:$0xff]  ;;  %v100_v29 = vld [vmem:[#allocation7 + $0x8] sm:$0xff]  ;;  %vm1134_vm7 = vcmask 122880   ;;  %vm1139_vm8 = vcmask 0  }
  0x3a   :  { %1387 = vpow2.f32 %v90_v8  ;;  %v622_v58 = vld [vmem:[#allocation2] sm:$0xff]  ;;  %s1513_s3 = smov [#allocation9]  }
  0x3b   :  { %v67_v3 = vadd.s32 8, %v66_v1  ;;  %vm82_vm0 = vcmp.eq.s32.totalorder %v66_v1, %v69_v2  ;;  %vm70_vm1 = vcmp.gt.s32.totalorder %v66_v1, %v69_v2  ;;  %vm76_vm5 = vcmp.lt.s32.totalorder %v66_v1, %v69_v2  ;;  %s1159_s13 = sshll.u32 %s1513_s3, 4  ;;  %s1160_s13 = int_to_ptr.vmem [resolvable:$true] %s1159_s13 }
  0x3c   :  { %v1173_v5 = vsel %vm70_vm1, 1.0, %v1512_v4  ;;  %v1177_v7 = vsel %vm82_vm0, 1.0, %v1512_v4  ;;  %v106_v24 = vsub.s32 0, %v66_v1  ;;  %v1175_v26 = vsel %vm76_vm5, 1.0, %v1512_v4  ;;  %s1455_s14 = scalar_lea.vmem %s1160_s13, 16  ;;  %s1459_s15 = scalar_lea.vmem %s1160_s13, 32 }
  0x3d   :  { %vm83_vm2 = vcmp.eq.s32.totalorder %v67_v3, %v69_v2  ;;  %vm71_vm3 = vcmp.gt.s32.totalorder %v67_v3, %v69_v2  ;;  %v95_v12 = vmul.f32 %v1173_v5, %v93_v9  ;;  %vm77_vm6 = vcmp.lt.s32.totalorder %v67_v3, %v69_v2  ;;  %v623_v2 = vld [vmem:[#allocation2 + $0x8] sm:$0xff]  ;;  %p1456_p10 = scmp.ne.s32.totalorder %s1160_s13, %s1455_s14  ;;  %p1460_p11 = scmp.lt.s32.totalorder %s1160_s13, %s1160_s13 }
  0x3e   :  { %v1174_v10 = vsel %vm71_vm3, 1.0, %v1512_v4  ;;  %v1178_v11 = vsel %vm83_vm2, 1.0, %v1512_v4  ;;  %v1176_v27 = vsel %vm77_vm6, 1.0, %v1512_v4  ;;  %v101_v34 = vmul.f32 %v1175_v26, %v99_v28  ;;  %p1461_p12 = scmp.lt.s32.totalorder %s1459_s15, %s1455_s14 }
  0x3f   :  { %v96_v14 = vmul.f32 %v1174_v10, %v94_v13  ;;  %v97_v15 = vadd.f32 %v1177_v7, %v95_v12  ;;  %v102_v35 = vmul.f32 %v1176_v27, %v100_v29  ;;  %v625_v59 = vsel %vm113_vm4, %v622_v58, 0 }
  0x40   :  { %v697_v60 = vand.u32 4294901760, %v625_v59  ;;  %v1135_v1 = vsel %vm1134_vm7, %v1605_v6, 0.0  ;;  %v628_v3 = vsel %vm113_vm4, %v623_v2, 0  ;;  %p1462_p13 = por %p1461_p12, %p1460_p11 }
  0x41   :  { %v98_v16 = vadd.f32 %v1178_v11, %v96_v14  ;;  %v115_v17 = vsel %vm113_vm4, %v97_v15, 0  ;;  %1136 = vadd.xlane.f32.xlu0 %v1135_v1  ;;  %v707_v4 = vand.u32 4294901760, %v628_v3 }
  0x42   :  { %v1609_v18 = vand.u32 4294901760, %v115_v17  ;;  %v698_v61 = vsub.f32 %v625_v59, %v697_v60  ;;  %p1463_p0 = pnand %p1462_p13, %p1456_p10 }
  0x43   :  { %v118_v19 = vsel %vm113_vm4, %v98_v16, 0  ;;  %v708_v5 = vsub.f32 %v628_v3, %v707_v4 }
  0x44   :  { %v188_v20 = vsub.f32 %v115_v17, %v1609_v18  ;;  %v197_v21 = vand.u32 4294901760, %v118_v19  ;;  %v1388_v25 = vpop.eup %1387  ;;  %v699_v62 = vand.u32 4294901760, %v698_v61 }
  0x45   :  { %v92_v31 = vmul.f32 %v1388_v25, %v89_v22 }
  0x46   :  { %v189_v23 = vand.u32 4294901760, %v188_v20  ;;  %v198_v32 = vsub.f32 %v118_v19, %v197_v21  ;;  %v700_v63 = vsub.f32 %v698_v61, %v699_v62 }
  0x47   :  { %v107_v36 = vrot.slane %v92_v31, %v106_v24 }
  0x48   :  { %v190_v30 = vsub.f32 %v188_v20, %v189_v23  ;;  %v199_v39 = vand.u32 4294901760, %v198_v32  ;;  %v701_v0 = vand.u32 4294901760, %v700_v63 }
  0x49   :  { %v109_v37 = vmul.f32 %v1177_v7, %v107_v36  ;;  %v110_v38 = vmul.f32 %v1178_v11, %v107_v36  ;;  %v709_v7 = vand.u32 4294901760, %v708_v5 }
  0x4a   :  { %v191_v33 = vand.u32 4294901760, %v190_v30  ;;  %v200_v44 = vsub.f32 %v198_v32, %v199_v39  ;;  %1273 = vmatprep.mubr.f32.mxu1 %v701_v0 }
  0x4b   :  { %v111_v40 = vadd.f32 %v109_v37, %v101_v34  ;;  %v112_v41 = vadd.f32 %v110_v38, %v102_v35  ;;  %v710_v12 = vsub.f32 %v708_v5, %v709_v7 }
  0x4c   :  { %1231 = vmatprep.mubr.f32.mxu0 %v191_v33  ;;  %v201_v48 = vand.u32 4294901760, %v200_v44 }
  0x4d   :  { %v121_v42 = vand.u32 4294901760, %v111_v40  ;;  %v124_v43 = vand.u32 4294901760, %v112_v41 }
  0x4f   :  { %v1311_v45 = vpack.c.bf16 %v124_v43, %v121_v42  ;;  %v209_v46 = vsub.f32 %v111_v40, %v121_v42  ;;  %v216_v47 = vsub.f32 %v112_v41, %v124_v43 }
  0x51   :  { %1312 = vmatprep.subr.bf16.mxu0 %v1311_v45  ;;  %v210_v49 = vand.u32 4294901760, %v209_v46  ;;  %v217_v50 = vand.u32 4294901760, %v216_v47  ;;  %v1319_v56 = vpack.c.bf16 %v216_v47, %v209_v46 }
  0x52   :  { %1314 = vmatpush3.bf16.msra.mxu0 %v1311_v45 }
  0x53   :  { %v211_v51 = vsub.f32 %v209_v46, %v210_v49  ;;  %v218_v52 = vsub.f32 %v216_v47, %v217_v50  ;;  %v1327_v57 = vpack.c.bf16 %v217_v50, %v210_v49 }
  0x55   :  { %1232 = vmatmul.mubr.f32.vlgmr.msra.gmra.mrb[0].mxu0 %v201_v48  ;;  %v212_v53 = vand.u32 4294901760, %v211_v51  ;;  %v219_v54 = vand.u32 4294901760, %v218_v52 }
  0x56   :  { %1238 = vmatprep.mubr.f32.mxu0 %v1609_v18 }
  0x57   :  { %v1315_v55 = vpack.c.bf16 %v219_v54, %v212_v53 }
  0x59   :  { %1316 = vmatprep.subr.bf16.mxu0 %v1315_v55 }
  0x5a   :  { %1318 = vmatpush3.bf16.msra.mxu0 %v1315_v55 }
  0x5b   :  { %1320 = vmatprep.subr.bf16.mxu0 %v1319_v56 }
  0x5d   :  { %1239 = vmatmul.mubr.f32.vlgmr.msra.gmra.mrb[0].mxu0 %v197_v21 }
  0x5e   :  { %1322 = vmatpush3.bf16.msra.mxu0 %v1319_v56  ;;  %1245 = vmatprep.mubr.f32.mxu0 %v188_v20 }
  0x5f   :  { %1324 = vmatprep.subr.bf16.mxu0 %v1311_v45 }
  0x65   :  { %1246 = vmatmul.mubr.f32.vlgmr.msra.gmra.mrb[0].mxu0 %v198_v32 }
  0x66   :  { %1326 = vmatpush3.bf16.msra.mxu0 %v1311_v45  ;;  %1252 = vmatprep.mubr.f32.mxu0 %v189_v23 }
  0x67   :  { %1328 = vmatprep.subr.bf16.mxu0 %v1327_v57 }
  0x6d   :  { %1253 = vmatmul.mubr.f32.vlgmr.msra.gmra.mrb[0].mxu0 %v199_v39 }
  0x6e   :  { %1330 = vmatpush3.bf16.msra.mxu0 %v1327_v57  ;;  %1259 = vmatprep.mubr.f32.mxu0 %v1609_v18 }
  0x6f   :  { %1332 = vmatprep.subr.bf16.mxu0 %v1311_v45 }
  0x75   :  { %1260 = vmatmul.mubr.f32.vlgmr.msra.gmra.mrb[0].mxu0 %v197_v21 }
  0x76   :  { %1334 = vmatpush3.bf16.msra.mxu0 %v1311_v45  ;;  %1266 = vmatprep.mubr.f32.mxu0 %v1609_v18  ;;  %v711_v18 = vand.u32 4294901760, %v710_v12 }
  0x7d   :  { %1267 = vmatmul.mubr.f32.vlgmr.msra.gmra.mrb[0].mxu0 %v197_v21 }
  0xce   :  { %v1137_v25 = vpop.xlane.xlu0 %1136 }
  0xcf   :  { %v1138_v26 = vmul.f32 256.0, %v1137_v25 }
  0xd1   :  { %1140 = vst.msk [vmem:[#allocation9] sm:$0x1] %vm1139_vm8, %v1138_v26 }
 0x150   :  { %v1268_v8 = vpop.f32.mrb[0].mxu0 }
 0x151   :  { %v634_v9 = vand.u32 4294901760, %v1268_v8  ;;  %v612_v10 = vpop.f32.mrb[1].mxu0 }
 0x152   :  { %v631_v11 = vand.u32 4294901760, %v612_v10 }
 0x153   :  { %v726_v13 = vsub.f32 %v1268_v8, %v634_v9 }
 0x154   :  { %v1335_v14 = vpack.c.bf16 %v634_v9, %v631_v11  ;;  %v719_v15 = vsub.f32 %v612_v10, %v631_v11 }
 0x155   :  { %v727_v16 = vand.u32 4294901760, %v726_v13 }
 0x156   :  { %v720_v17 = vand.u32 4294901760, %v719_v15  ;;  %1336 = vmatprep.subr.bf16.mxu1 %v1335_v14  ;;  %v1343_v6 = vpack.c.bf16 %v726_v13, %v719_v15 }
 0x157   :  { %v728_v19 = vsub.f32 %v726_v13, %v727_v16  ;;  %1338 = vmatpush3.bf16.msra.mxu1 %v1335_v14 }
 0x158   :  { %v721_v20 = vsub.f32 %v719_v15, %v720_v17  ;;  %v1351_v21 = vpack.c.bf16 %v727_v16, %v720_v17 }
 0x159   :  { %v729_v22 = vand.u32 4294901760, %v728_v19 }
 0x15a   :  { %v722_v23 = vand.u32 4294901760, %v721_v20  ;;  %1274 = vmatmul.mubr.f32.vlgmr.msra.gmra.mrb[0].mxu1 %v711_v18 }
 0x15b   :  { %1280 = vmatprep.mubr.f32.mxu1 %v697_v60 }
 0x15c   :  { %v1339_v24 = vpack.c.bf16 %v729_v22, %v722_v23 }
 0x15e   :  { %1340 = vmatprep.subr.bf16.mxu1 %v1339_v24 }
 0x15f   :  { %1342 = vmatpush3.bf16.msra.mxu1 %v1339_v24 }
 0x160   :  { %1344 = vmatprep.subr.bf16.mxu1 %v1343_v6 }
 0x162   :  { %1281 = vmatmul.mubr.f32.vlgmr.msra.gmra.mrb[0].mxu1 %v707_v4 }
 0x163   :  { %1346 = vmatpush3.bf16.msra.mxu1 %v1343_v6  ;;  %1287 = vmatprep.mubr.f32.mxu1 %v698_v61 }
 0x164   :  { %1348 = vmatprep.subr.bf16.mxu1 %v1335_v14 }
 0x16a   :  { %1288 = vmatmul.mubr.f32.vlgmr.msra.gmra.mrb[0].mxu1 %v708_v5 }
 0x16b   :  { %1350 = vmatpush3.bf16.msra.mxu1 %v1335_v14  ;;  %1294 = vmatprep.mubr.f32.mxu1 %v699_v62 }
 0x16c   :  { %1352 = vmatprep.subr.bf16.mxu1 %v1351_v21 }
 0x172   :  { %1295 = vmatmul.mubr.f32.vlgmr.msra.gmra.mrb[0].mxu1 %v709_v7 }
 0x173   :  { %1354 = vmatpush3.bf16.msra.mxu1 %v1351_v21  ;;  %1301 = vmatprep.mubr.f32.mxu1 %v697_v60 }
 0x174   :  { %1356 = vmatprep.subr.bf16.mxu1 %v1335_v14 }
 0x17a   :  { %1302 = vmatmul.mubr.f32.vlgmr.msra.gmra.mrb[0].mxu1 %v707_v4 }
 0x17b   :  { %1358 = vmatpush3.bf16.msra.mxu1 %v1335_v14  ;;  %1308 = vmatprep.mubr.f32.mxu1 %v697_v60 }
 0x182   :  { %1309 = vmatmul.mubr.f32.vlgmr.msra.gmra.mrb[0].mxu1 %v707_v4 }
 0x183   :  { %1466 = shalt.err (!%p1463_p0)
}
 0x184   :  { %s1467_s18 = scalar_lea.hbm %s1657_s6, 16 }
 0x185   :  { %p1468_p1 = scmp.ne.s32.totalorder %s1657_s6, %s1467_s18  ;;  %p1471_p2 = scmp.lt.u32.totalorder %s1467_s18, %s1657_s6 }
 0x187   :  { %p1473_p3 = pnand %p1471_p2, %p1468_p1 }
 0x189   :  { %1476 = shalt.err (!%p1473_p3)
}
 0x18a   :  { %1162 = dma.vmem_to_hbm [thread:$0]  %s1160_s13, 16, %s1657_s6, [#allocation10]  }
 0x18b   :  { %s1514_s25 = smov [#allocation8]  }
 0x18c   :  { %s1146_s26 = sshll.u32 %s1514_s25, 4  ;;  %s1147_s26 = int_to_ptr.vmem [resolvable:$true] %s1146_s26 }
 0x18d   :  { %s1477_s27 = scalar_lea.vmem %s1147_s26, 256  ;;  %p1482_p5 = scmp.lt.s32.totalorder %s1147_s26, %s1147_s26 }
 0x18e   :  { %p1478_p4 = scmp.ne.s32.totalorder %s1147_s26, %s1477_s27  ;;  %p1483_p6 = scmp.lt.s32.totalorder %s1477_s27, %s1477_s27 }
 0x190   :  { %p1484_p7 = por %p1483_p6, %p1482_p5 }
 0x192   :  { %p1485_p8 = pnand %p1484_p7, %p1478_p4 }
 0x255   :  { %v1310_v27 = vpop.f32.mrb[0].mxu1 }
 0x256   :  { %1133 = vst.msk [vmem:[#allocation8 + $0x8] sm:$0xff] %vm113_vm4, %v1310_v27  ;;  %v1122_v28 = vpop.f32.mrb[1].mxu1 }
 0x257   :  { %1132 = vst.msk [vmem:[#allocation8] sm:$0xff] %vm113_vm4, %v1122_v28 }
 0x258   :  { %1488 = shalt.err (!%p1485_p8)
}
 0x259   :  { %s1489_s6 = scalar_lea.hbm %s1656_s5, 256 }
 0x25a   :  { %p1490_p9 = scmp.ne.s32.totalorder %s1656_s5, %s1489_s6  ;;  %p1493_p10 = scmp.lt.u32.totalorder %s1489_s6, %s1656_s5 }
 0x25c   :  { %p1495_p11 = pnand %p1493_p10, %p1490_p9 }
 0x25e   :  { %1498 = shalt.err (!%p1495_p11)
}
 0x25f   :  { %1152 = dma.vmem_to_hbm [thread:$0]  %s1147_s26, 256, %s1656_s5, [#allocation4], %s1509_s9, %s1509_s9, %s1510_s10  }
 0x260   :  { %1503 = dma.done.wait [#allocation4], 256  }
 0x261   :  { %1504 = vsyncadd [#allocation4], 4294967040 }
 0x262   :  { %1505 = dma.done.wait [#allocation10], 16  }
 0x263   :  { %1506 = vsyncadd [#allocation10], 4294967280 }
 0x264   :  { %1169 = vsyncpa [#allocation3], 1 }
 0x265   :  { %1170 = vsyncpa [#allocation6], 1 }
 0x266   :  { %1171 = vsyncpa [#allocation4], 1 }
 0x267   :  { %1172 = vsyncpa [#allocation10], 1 }

</bundles_post_ra>
